<compile_context>
chip_gen: v7x
topology: tpu7x:2x2x1
jax: 0.10.0
libtpu: 0.0.40
codegen_flags: <defaults>
</compile_context>

<pallas_src>
import functools

import jax
import jax.numpy as jnp
from jax.experimental import pallas as pl
from jax.experimental.pallas import tpu as pltpu


def _round_up(x, m):
    return ((x + m - 1) // m) * m


def _distill_kl_kernel(ys_ref, yt_ref, out_ref, *, inv_temperature, final_scale):
    b = pl.program_id(0)

    # Load tile, promote to f32, scale by 1/T with a constant multiply (VPU).
    ys = ys_ref[...].astype(jnp.float32) * inv_temperature
    yt = yt_ref[...].astype(jnp.float32) * inv_temperature

    # Max-shifted logits for numerical stability.
    ys_sh = ys - jnp.max(ys, axis=1, keepdims=True)
    yt_sh = yt - jnp.max(yt, axis=1, keepdims=True)

    ys_sum = jnp.sum(jnp.exp(ys_sh), axis=1, keepdims=True)   # (TB, 1)
    yt_exp = jnp.exp(yt_sh)                                   # (TB, C)
    yt_sum = jnp.sum(yt_exp, axis=1, keepdims=True)           # (TB, 1)

    # Folded KL per row:
    #   sum_c p_t * (log p_t - log p_s)
    # = (1/yt_sum) * sum_c yt_exp*(yt_sh - ys_sh) + log(ys_sum) - log(yt_sum)
    cross = jnp.sum(yt_exp * (yt_sh - ys_sh), axis=1, keepdims=True)  # (TB, 1)
    kl_row = (
        cross * pl.reciprocal(yt_sum, approx=False)
        + jnp.log(ys_sum)
        - jnp.log(yt_sum)
    )

    partial = jnp.sum(kl_row, keepdims=True)                  # (1, 1)

    @pl.when(b == 0)
    def _():
        out_ref[...] = jnp.zeros_like(out_ref)

    out_ref[...] += partial

    @pl.when(b == pl.num_programs(0) - 1)
    def _():
        # Fold the T^2 / batch normalization into the last step.
        out_ref[...] *= final_scale


# Pipelined working-set budget for tile sizing (safe on v5e/v6e/v7x once the
# scoped-VMEM limit is requested explicitly below).
_TILE_VMEM_BUDGET = 24 * 1024 * 1024


def _plan_tiling(B, C, dtype, block_rows=None):
    """Pick (tile_rows, padded_batch, grid, vmem_limit_bytes)."""
    itemsize = jnp.dtype(dtype).itemsize
    # Sublane packing granularity: f32 -> 8 rows, bf16 -> 16, int8/fp8 -> 32.
    row_align = {4: 8, 2: 16, 1: 32}.get(itemsize, 8)
    # VMEM bytes per tile row: 2 inputs x 2 pipeline buffers (input dtype)
    # + ~6 f32 temporaries for the fused softmax/KL math.
    per_row = C * (2 * 2 * itemsize + 6 * 4)

    if block_rows is None:
        max_rows = max(row_align,
                       (_TILE_VMEM_BUDGET // per_row) // row_align * row_align)
        # ~512-1024 row tiles reach ~85% of HBM roofline when C allows.
        tb = min(1024, max_rows, _round_up(B, row_align))
        if B > row_align:
            # Keep >= 2 grid steps when the batch has >= 2 aligned blocks of
            # real data (better pipelining; and a future per-block-partials
            # variant could shard the axis across v7x's 2 TensorCores).
            tb = min(tb, _round_up(pl.cdiv(B, 2), row_align))
        tb = max(tb, row_align)
        # Rebalance so zero-padding waste is minimal.
        grid_b = pl.cdiv(B, tb)
        tb = _round_up(pl.cdiv(B, grid_b), row_align)
    else:
        tb = int(block_rows)
        assert tb % row_align == 0, (tb, row_align)
        grid_b = pl.cdiv(B, tb)

    b_pad = grid_b * tb

    # Explicit scoped-VMEM request: actual tile need + slack, clamped to stay
    # well under v7x's 64 MiB physical VMEM and above v5e's 16 MiB default.
    vmem_limit = int(min(max(tb * per_row + 8 * 1024 * 1024, 16 * 1024 * 1024),
                         48 * 1024 * 1024))
    return tb, b_pad, grid_b, vmem_limit


def distill_kl(y_s, y_t, temperature, *, block_rows=None):
    """Pallas TPU implementation of DistillKL(T).forward(y_s, y_t) -> scalar f32.

    `temperature` must be a static Python number (it is a constructor
    hyper-parameter in the nn.Module).  Inputs may be f32 or bf16.
    """
    assert y_s.shape == y_t.shape and y_s.ndim == 2
    B, C = y_s.shape
    T = float(temperature)

    tb, b_pad, grid_b, vmem_limit = _plan_tiling(B, C, y_s.dtype, block_rows)

    if b_pad != B:
        # Padded rows are identical (all zeros) in y_s and y_t, so their KL
        # contribution is exactly 0; normalization below uses the original B.
        pad = ((0, b_pad - B), (0, 0))
        y_s = jnp.pad(y_s, pad)
        y_t = jnp.pad(y_t, pad)

    kernel = functools.partial(
        _distill_kl_kernel,
        inv_temperature=1.0 / T,
        final_scale=T * T / B,
    )

    itemsize = jnp.dtype(y_s.dtype).itemsize
    cost = pl.CostEstimate(
        flops=12 * b_pad * C,
        transcendentals=2 * b_pad * C + 3 * b_pad,
        bytes_accessed=2 * b_pad * C * itemsize + 4,
    )

    out = pl.pallas_call(
        kernel,
        out_shape=jax.ShapeDtypeStruct((1, 1), jnp.float32),
        grid=(grid_b,),
        in_specs=[
            pl.BlockSpec((tb, C), lambda i: (i, 0)),
            pl.BlockSpec((tb, C), lambda i: (i, 0)),
        ],
        # Resident (1,1) accumulator: same output block every grid step, so it
        # stays in VMEM and is written back to HBM once.  The batch axis must
        # therefore be "arbitrary" (sequential accumulation).
        out_specs=pl.BlockSpec((1, 1), lambda i: (0, 0)),
        compiler_params=pltpu.CompilerParams(
            dimension_semantics=("arbitrary",),
            vmem_limit_bytes=vmem_limit,
        ),
        cost_estimate=cost,
    )(y_s, y_t)

    return out[0, 0]


def _distill_kl_ref(y_s, y_t, temperature):
    # Pure-JAX reference for correctness checking.
    T = float(temperature)
    log_p_s = jax.nn.log_softmax(y_s.astype(jnp.float32) / T, axis=1)
    p_t = jax.nn.softmax(y_t.astype(jnp.float32) / T, axis=1)
    log_p_t = jax.nn.log_softmax(y_t.astype(jnp.float32) / T, axis=1)
    kl = jnp.sum(p_t * (log_p_t - log_p_s))
    return kl * T * T / y_s.shape[0]


if __name__ == "__main__":
    # DistillKL has no learned parameters; only the temperature hyper-parameter.
    T = 4.0
    # Small, deliberately awkward shapes: batch=12 exercises the zero-padding
    # path and a 2-step grid; classes=40 stays on a single lane tile.
    B, C = 12, 40

    key = jax.random.PRNGKey(0)
    k1, k2 = jax.random.split(key)
    y_s = jax.random.normal(k1, (B, C), dtype=jnp.float32)
    y_t = jax.random.normal(k2, (B, C), dtype=jnp.float32)

    loss = distill_kl(y_s, y_t, T)
    loss = jax.block_until_ready(loss)

    ref = _distill_kl_ref(y_s, y_t, T)
    assert jnp.allclose(loss, ref, rtol=1e-5, atol=1e-5), (loss, ref)

    print("KERNEL_OK")
</pallas_src>

<mosaic_0001>
module attributes {stable_mosaic.version = 11 : i64} {
  func.func @_distill_kl_kernel(%arg0: i32, %arg1: memref<8x40xf32, #tpu.memory_space<vmem>>, %arg2: memref<8x40xf32, #tpu.memory_space<vmem>>, %arg3: memref<1x1xf32, #tpu.memory_space<vmem>>) attributes {dimension_semantics = [#tpu.dimension_semantics<arbitrary>], iteration_bounds = array<i64: 2>, scalar_prefetch = 0 : i64, scratch_operands = 0 : i64, tpu.core_type = #tpu.core_type<tc>, window_params = [{transform_indices = @transform_0, window_bounds = array<i64: 8, 40>}, {transform_indices = @transform_1, window_bounds = array<i64: 8, 40>}, {pipeline_mode = #tpu.pipeline_mode<synchronous>, transform_indices = @transform_2, window_bounds = array<i64: 1, 1>}]} {
    %c0 = arith.constant 0 : index
    %c0_0 = arith.constant 0 : index
    %0 = vector.load %arg1[%c0, %c0_0] : memref<8x40xf32, #tpu.memory_space<vmem>>, vector<8x40xf32>
    %cst = arith.constant 2.500000e-01 : f32
    %1 = vector.broadcast %cst : f32 to vector<8x40xf32>
    %2 = arith.mulf %0, %1 : vector<8x40xf32>
    %c0_1 = arith.constant 0 : index
    %c0_2 = arith.constant 0 : index
    %3 = vector.load %arg2[%c0_1, %c0_2] : memref<8x40xf32, #tpu.memory_space<vmem>>, vector<8x40xf32>
    %cst_3 = arith.constant 2.500000e-01 : f32
    %4 = vector.broadcast %cst_3 : f32 to vector<8x40xf32>
    %5 = arith.mulf %3, %4 : vector<8x40xf32>
    %cst_4 = arith.constant dense<0xFF800000> : vector<8xf32>
    %6 = vector.multi_reduction <maximumf>, %2, %cst_4 [1] : vector<8x40xf32> to vector<8xf32>
    %7 = vector.shape_cast %6 : vector<8xf32> to vector<8x1xf32>
    %8 = vector.broadcast %7 : vector<8x1xf32> to vector<8x40xf32>
    %9 = arith.subf %2, %8 : vector<8x40xf32>
    %cst_5 = arith.constant dense<0xFF800000> : vector<8xf32>
    %10 = vector.multi_reduction <maximumf>, %5, %cst_5 [1] : vector<8x40xf32> to vector<8xf32>
    %11 = vector.shape_cast %10 : vector<8xf32> to vector<8x1xf32>
    %12 = vector.broadcast %11 : vector<8x1xf32> to vector<8x40xf32>
    %13 = arith.subf %5, %12 : vector<8x40xf32>
    %14 = math.exp %9 : vector<8x40xf32>
    %cst_6 = arith.constant dense<0.000000e+00> : vector<8xf32>
    %15 = vector.multi_reduction <add>, %14, %cst_6 [1] : vector<8x40xf32> to vector<8xf32>
    %16 = vector.shape_cast %15 : vector<8xf32> to vector<8x1xf32>
    %17 = math.exp %13 : vector<8x40xf32>
    %cst_7 = arith.constant dense<0.000000e+00> : vector<8xf32>
    %18 = vector.multi_reduction <add>, %17, %cst_7 [1] : vector<8x40xf32> to vector<8xf32>
    %19 = vector.shape_cast %18 : vector<8xf32> to vector<8x1xf32>
    %20 = arith.subf %13, %9 : vector<8x40xf32>
    %21 = arith.mulf %17, %20 : vector<8x40xf32>
    %cst_8 = arith.constant dense<0.000000e+00> : vector<8xf32>
    %22 = vector.multi_reduction <add>, %21, %cst_8 [1] : vector<8x40xf32> to vector<8xf32>
    %23 = vector.shape_cast %22 : vector<8xf32> to vector<8x1xf32>
    %24 = tpu.reciprocal %19 : vector<8x1xf32> -> vector<8x1xf32>
    %25 = arith.mulf %23, %24 : vector<8x1xf32>
    %26 = math.log %16 : vector<8x1xf32>
    %27 = arith.addf %25, %26 : vector<8x1xf32>
    %28 = math.log %19 : vector<8x1xf32>
    %29 = arith.subf %27, %28 : vector<8x1xf32>
    %30 = vector.shape_cast %29 : vector<8x1xf32> to vector<1x8x1xf32>
    %cst_9 = arith.constant dense<0.000000e+00> : vector<1xf32>
    %31 = vector.multi_reduction <add>, %30, %cst_9 [1, 2] : vector<1x8x1xf32> to vector<1xf32>
    %32 = vector.shape_cast %31 : vector<1xf32> to vector<1x1x1xf32>
    %33 = vector.extract %32[0, 0, 0] : f32 from vector<1x1x1xf32>
    %34 = vector.broadcast %33 : f32 to vector<1x1xf32>
    %c0_i32 = arith.constant 0 : i32
    %35 = arith.cmpi eq, %arg0, %c0_i32 : i32
    %36 = arith.extui %35 : i1 to i32
    %c0_i32_10 = arith.constant 0 : i32
    %37 = arith.cmpi ne, %36, %c0_i32_10 : i32
    scf.if %37 {
      %cst_16 = arith.constant 0.000000e+00 : f32
      %44 = vector.broadcast %cst_16 : f32 to vector<1x1xf32>
      %c0_17 = arith.constant 0 : index
      %c0_18 = arith.constant 0 : index
      %45 = vector.load %arg3[%c0_17, %c0_18] : memref<1x1xf32, #tpu.memory_space<vmem>>, vector<1x1xf32>
      tpu.vector_store %arg3[%c0_17, %c0_18], %44 {strides = array<i32>} : memref<1x1xf32, #tpu.memory_space<vmem>>, vector<1x1xf32>,
    } else {
    }
    %c0_11 = arith.constant 0 : index
    %c0_12 = arith.constant 0 : index
    %38 = vector.load %arg3[%c0_11, %c0_12] : memref<1x1xf32, #tpu.memory_space<vmem>>, vector<1x1xf32>
    %39 = arith.addf %38, %34 : vector<1x1xf32>
    %c0_13 = arith.constant 0 : index
    %c0_14 = arith.constant 0 : index
    %40 = vector.load %arg3[%c0_13, %c0_14] : memref<1x1xf32, #tpu.memory_space<vmem>>, vector<1x1xf32>
    tpu.vector_store %arg3[%c0_13, %c0_14], %39 {strides = array<i32>} : memref<1x1xf32, #tpu.memory_space<vmem>>, vector<1x1xf32>,
    %c1_i32 = arith.constant 1 : i32
    %41 = arith.cmpi eq, %arg0, %c1_i32 : i32
    %42 = arith.extui %41 : i1 to i32
    %c0_i32_15 = arith.constant 0 : i32
    %43 = arith.cmpi ne, %42, %c0_i32_15 : i32
    scf.if %43 {
      %c0_16 = arith.constant 0 : index
      %c0_17 = arith.constant 0 : index
      %44 = vector.load %arg3[%c0_16, %c0_17] : memref<1x1xf32, #tpu.memory_space<vmem>>, vector<1x1xf32>
      %cst_18 = arith.constant 1.33333337 : f32
      %45 = vector.broadcast %cst_18 : f32 to vector<1x1xf32>
      %46 = arith.mulf %44, %45 : vector<1x1xf32>
      %c0_19 = arith.constant 0 : index
      %c0_20 = arith.constant 0 : index
      %47 = vector.load %arg3[%c0_19, %c0_20] : memref<1x1xf32, #tpu.memory_space<vmem>>, vector<1x1xf32>
      tpu.vector_store %arg3[%c0_19, %c0_20], %46 {strides = array<i32>} : memref<1x1xf32, #tpu.memory_space<vmem>>, vector<1x1xf32>,
    } else {
    }
    return
  }
  func.func @transform_0(%arg0: i32) -> (i32, i32) {
    %c0_i32 = arith.constant 0 : i32
    %c0_i32_0 = arith.constant 0 : i32
    return %arg0, %c0_i32 : i32, i32
  }
  func.func @transform_1(%arg0: i32) -> (i32, i32) {
    %c0_i32 = arith.constant 0 : i32
    %c0_i32_0 = arith.constant 0 : i32
    return %arg0, %c0_i32 : i32, i32
  }
  func.func @transform_2(%arg0: i32) -> (i32, i32) {
    %c0_i32 = arith.constant 0 : i32
    %c0_i32_0 = arith.constant 0 : i32
    %c0_i32_1 = arith.constant 0 : i32
    return %c0_i32, %c0_i32_0 : i32, i32
  }
}

</mosaic_0001>

<bundles_post_ra>
// kernel: tpu_custom_call.1
= control target key start
LH: loop header
LB: loop body
LE: loop exit
PB: predicated region body
PF: predicated region fallthrough
CT: control target
= control target key end

     0   :  { %7 = vsyncpa [#allocation3], 0  ;;  %s737_s0 = inlined_call_operand.hbm [shape: f32[16,40], index: 0, kind: input, shape index: {}]   ;;  %s738_s1 = inlined_call_operand.hbm [shape: f32[16,40], index: 1, kind: input, shape index: {}]   ;;  %s739_s2 = inlined_call_operand.hbm [shape: f32[1,1], index: 2, kind: output, shape index: {}]  }
   0x1   :  { %9 = vsyncpa [#allocation3 + $0x1], 0 }
   0x2   :  { %10 = vsyncpa [#allocation6], 0 }
   0x3   :  { %12 = vsyncpa [#allocation6 + $0x1], 0 }
   0x4   :  { %13 = vsyncpa [#allocation4], 0  ;;  %s558_s9 = smov 0   ;;  %s560_s10 = smov 0  }
   0x5   :  { %s562_s11 = smov 0   ;;  %s564_s12 = smov 0  }
   0x6 LB: > { %s577_s13 = sadd.s32 4294967295, %s537_s12   ;;  %s580_s14 = sadd.s32 1, %s537_s12   ;;  %s537_s12 = sphi %s564_s12, %s751_s12   ;;  %s533_s11 = sphi %s562_s11, %s750_s11   ;;  %s529_s10 = sphi %s560_s10, %s749_s10   ;;  %s525_s9 = sphi %s558_s9, %s748_s9  }
   0x7   : > { %s23_s15 = ssub.s32 %s537_s12, %s580_s14  ;;  %s26_s16 = sadd.s32 1, %s533_s11 }
   0x8   : > { %p24_p0 = scmp.eq.s32.totalorder %s23_s15, 0  ;;  %p33_p1 = scmp.ne.s32.totalorder %s533_s11, %s529_s10 }
   0x9   : > { %p34_p2 = scmp.eq.s32.totalorder %s537_s12, 0  ;;  %p39_p3 = scmp.ne.s32.totalorder %s529_s10, %s525_s9 }
   0xa   : > { %s590_s17 = scalar_select %p24_p0, %s533_s11, %s26_s16  }
   0xb   : > { %p35_p4 = por %p34_p2, %p33_p1  ;;  %p40_p5 = scmp.eq.s32.totalorder %s577_s13, 0 }
   0xc   : > { %p362_p6 = scmp.lt.s32.totalorder %s537_s12, 2  ;;  %s599_s19 = sand.u32 1, %s533_s11  }
   0xd   : > { %p594_p7 = por %p40_p5, %p39_p3  ;;  %s332_s20 = sshll.u32 %s599_s19, 3 }
   0xe   : > { %s333_s21 = sshll.u32 %s537_s12, 7  ;;  %s114_s25 = scalar_lea.vmem [#allocation2], %s332_s20 }
   0xf   : > { %s741_s18 = scalar_select %p594_p7, 1, 0 }
  0x10   : > { %s608_s24 = scalar_lea.hbm %s737_s0, %s333_s21  ;;  %s121_s26 = sshll.u32 %s114_s25, 4  ;;  %s612_s26 = int_to_ptr.vmem [resolvable:$true] %s121_s26 }
  0x11   : > { %p614_p8 = pnand %p362_p6, %p35_p4  ;;  %s111_s28 = scalar_lea.sflag [#allocation3], %s599_s19 }
  0x12   : > { %s409_s29 = scalar_lea.hbm %s608_s24, 128  ;;  %s414_s4 = scalar_lea.hbm %s737_s0, 256 }
  0x13   : > { %p410_p11 = scmp.ne.s32.totalorder %s608_s24, %s409_s29  ;;  %p411_p12 = pneg %p614_p8 }
  0x14   : > { %p415_p1 = scmp.lt.u32.totalorder %s608_s24, %s737_s0  ;;  %p416_p2 = scmp.lt.u32.totalorder %s414_s4, %s409_s29 }
  0x15   : > { %p412_p13 = pnand %p411_p12, %p410_p11  ;;  %p418_p4 = scmp.lt.u32.totalorder %s409_s29, %s608_s24 }
  0x16   : > { %p417_p3 = por %p416_p2, %p415_p1 }
  0x17   : > { %p413_p0 = pneg %p412_p13 }
  0x18   : > { %p419_p5 = por %p418_p4, %p417_p3 }
  0x1a   : > { %p420_p6 = pnand %p419_p5, %p413_p0 }
  0x1c   : > { %423 = shalt.err (!%p420_p6)
}
  0x1d   : > { %s424_s7 = scalar_lea.vmem %s612_s26, 128  ;;  %s539_s8 = smov [#allocation2]  }
  0x1e   : > { %p425_p11 = scmp.ne.s32.totalorder %s612_s26, %s424_s7  ;;  %s429_s9 = sshll.u32 %s539_s8, 4  ;;  %s430_s9 = int_to_ptr.vmem [resolvable:$false] %s429_s9 }
  0x1f   : > { %s431_s15 = scalar_lea.vmem %s430_s9, 256  ;;  %p432_p10 = scmp.lt.s32.totalorder %s612_s26, %s430_s9 }
  0x20   : > { %p427_p13 = pnand %p425_p11, %p411_p12  ;;  %p433_p1 = scmp.lt.s32.totalorder %s431_s15, %s424_s7 }
  0x22   : > { %p428_p9 = pneg %p427_p13  ;;  %p434_p2 = por %p433_p1, %p432_p10 }
  0x24   : > { %p435_p3 = pnand %p434_p2, %p428_p9 }
  0x26   : > { %438 = shalt.err (!%p435_p3)
}
  0x27   : > { %358 = dma.hbm_to_vmem [thread:$0]  (!%p614_p8), %s608_s24, 128, %s612_s26, %s111_s28  }
  0x28   : > { %p743_p0 = scmp.lt.s32.totalorder %s537_s12, 3  ;;  %p744_p4 = scmp.ge.s32.totalorder %s537_s12, 1 }
  0x29   : > { %s659_s25 = scalar_lea.hbm %s738_s1, %s333_s21  ;;  %s132_s29 = scalar_lea.vmem [#allocation5], %s332_s20 }
  0x2a   : > { %p650_p5 = pnand %p744_p4, %p743_p0  ;;  %s139_s30 = sshll.u32 %s132_s29, 4  ;;  %s140_s30 = int_to_ptr.vmem [resolvable:$true] %s139_s30 }
  0x2b   : > { %s129_s24 = scalar_lea.sflag [#allocation6], %s599_s19  ;;  %s439_s26 = scalar_lea.hbm %s659_s25, 128 }
  0x2c   : > { %s745_s16 = scalar_select %p650_p5, 1, 0 }
  0x2d   : > { %p440_p9 = scmp.ne.s32.totalorder %s659_s25, %s439_s26  ;;  %s444_s21 = scalar_lea.hbm %s738_s1, 256 }
  0x2e   : > { %p445_p11 = scmp.lt.u32.totalorder %s659_s25, %s738_s1  ;;  %p446_p13 = scmp.lt.u32.totalorder %s444_s21, %s439_s26 }
  0x2f   : > { %p442_p10 = pnand %p440_p9, %p411_p12  ;;  %p448_p2 = scmp.lt.u32.totalorder %s439_s26, %s659_s25 }
  0x30   : > { %p447_p1 = por %p446_p13, %p445_p11 }
  0x31   : > { %p443_p6 = pneg %p442_p10 }
  0x32   : > { %p449_p3 = por %p448_p2, %p447_p1 }
  0x34   : > { %p450_p0 = pnand %p449_p3, %p443_p6 }
  0x36   : > { %453 = shalt.err (!%p450_p0)
}
  0x37   : > { %s454_s19 = scalar_lea.vmem %s140_s30, 128  ;;  %s540_s20 = smov [#allocation5]  }
  0x38   : > { %p455_p4 = scmp.ne.s32.totalorder %s140_s30, %s454_s19  ;;  %s459_s5 = sshll.u32 %s540_s20, 4  ;;  %s460_s5 = int_to_ptr.vmem [resolvable:$false] %s459_s5 }
  0x39   : > { %s461_s6 = scalar_lea.vmem %s460_s5, 256  ;;  %p462_p7 = scmp.lt.s32.totalorder %s140_s30, %s460_s5 }
  0x3a   : > { %p457_p9 = pnand %p455_p4, %p411_p12  ;;  %p463_p5 = scmp.lt.s32.totalorder %s461_s6, %s454_s19 }
  0x3c   : > { %p458_p10 = pneg %p457_p9  ;;  %p464_p11 = por %p463_p5, %p462_p7 }
  0x3e   : > { %p465_p13 = pnand %p464_p11, %p458_p10 }
  0x40   : > { %468 = shalt.err (!%p465_p13)
}
  0x41   : > { %361 = dma.hbm_to_vmem [thread:$0]  (!%p614_p8), %s659_s25, 128, %s140_s30, %s129_s24  }
  0x42   : > { %p746_p6 = scmp.ne.s32.totalorder %s745_s16, 0 }
  0x43   : > { %s150_s7 = sand.u32 (!%p746_p6), 1, %s529_s10   ;;  %p747_p12 = scmp.ne.s32.totalorder (!%p746_p6), %s741_s18, 0 }
  0x44   : > { %148 = sbr.rel (%p746_p6) target bundleno = 648 (0x288), region = 28  ;;  %s337_s8 = sshll.u32 (!%p746_p6), %s150_s7, 3 }
  0x45   : > { %s151_s9 = scalar_lea.sflag (!%p746_p6), [#allocation3], %s150_s7  ;;  %s154_s15 = scalar_lea.vmem (!%p746_p6), [#allocation2], %s337_s8 }
  0x4b   : > { %512 = dma.done.wait (%p747_p12), %s151_s9, 128  }
  0x4c   : > { %514 = vsyncadd (%p747_p12), %s151_s9, 4294967168  ;;  %s160_s22 = scalar_lea.sflag [#allocation6], %s150_s7  ;;  %s163_s23 = scalar_lea.vmem [#allocation5], %s337_s8 }
  0x4d   : > { %516 = dma.done.wait (%p747_p12), %s160_s22, 128  }
  0x4e   : > { %518 = vsyncadd (%p747_p12), %s160_s22, 4294967168  ;;  %v184_v0 = vld [vmem:[%s154_s15] sm:$0xff]  ;;  %vm188_vm0 = vcmask 326656   ;;  %v186_v1 = vld [vmem:[%s163_s23] sm:$0xff]  ;;  %vm220_vm1 = vcmask 7168   ;;  %p339_p7 = scmp.ne.s32.totalorder %s577_s13, 0 }
  0x4f   : > { %v185_v2 = vmul.f32 0.25, %v184_v0  ;;  %v187_v3 = vmul.f32 0.25, %v186_v1  ;;  %vm236_vm2 = vcmask (!%p339_p7), 0   ;;  %v541_v39 = vmov (!%p339_p7), 0.0  }
  0x50   : > { %237 = vst.msk [vmem:[#allocation7] sm:$0x1] (!%p339_p7), %vm236_vm2, %v541_v39 }
  0x51   : > { %v189_v4 = vsel %vm188_vm0, %v185_v2, -inf  ;;  %v193_v5 = vsel %vm188_vm0, %v187_v3, -inf }
  0x52   : > { %190 = vmax.xlane.f32.xlu0 %v189_v4 }
  0x56   : > { %194 = vmax.xlane.f32.xlu0 %v193_v5 }
  0xdf   : > { %v191_v6 = vpop.xlane.xlu0 %190 }
  0xe0   : > { %v192_v7 = vsub.f32 %v185_v2, %v191_v6 }
  0xe2   : > { %v197_v8 = vmul.f32 1.442695, %v192_v7 }
  0xe3   : > { %v195_v9 = vpop.xlane.xlu0 %194 }
  0xe4   : > { %399 = vpow2.f32 %v197_v8  ;;  %v196_v10 = vsub.f32 %v187_v3, %v195_v9 }
  0xe6   : > { %v202_v11 = vmul.f32 1.442695, %v196_v10  ;;  %v207_v14 = vsub.f32 %v196_v10, %v192_v7 }
  0xe8   : > { %401 = vpow2.f32 %v202_v11 }
  0xee   : > { %v400_v12 = vpop.eup %399 }
  0xef   : > { %v199_v13 = vsel %vm188_vm0, %v400_v12, 0.0 }
  0xf0   : > { %200 = vadd.xlane.f32.xlu1 %v199_v13 }
  0xf2   : > { %v402_v15 = vpop.eup %401 }
  0xf3   : > { %v204_v16 = vsel %vm188_vm0, %v402_v15, 0.0  ;;  %v208_v17 = vmul.f32 %v402_v15, %v207_v14 }
  0xf4   : > { %205 = vadd.xlane.f32.xlu1 %v204_v16 }
  0xf5   : > { %v209_v18 = vsel %vm188_vm0, %v208_v17, 0.0 }
  0xf6   : > { %210 = vadd.xlane.f32.xlu0 %v209_v18 }
 0x17d   : > { %v201_v19 = vpop.xlane.xlu1 %200 }
 0x17e   : > { %403 = vlog2.f32 %v201_v19 }
 0x181   : > { %v206_v20 = vpop.xlane.xlu1 %205 }
 0x182   : > { %405 = vrcp.f32 %v206_v20 }
 0x183   : > { %407 = vlog2.f32 %v206_v20  ;;  %v211_v23 = vpop.xlane.xlu0 %210 }
 0x188   : > { %v404_v21 = vpop.eup %403 }
 0x189   : > { %v215_v25 = vmul.f32 0.6931472, %v404_v21 }
 0x18c   : > { %v406_v22 = vpop.eup %405 }
 0x18d   : > { %v408_v24 = vpop.eup %407  ;;  %v213_v26 = vmul.f32 %v406_v22, %v211_v23 }
 0x18e   : > { %v218_v28 = vmul.f32 0.6931472, %v408_v24 }
 0x18f   : > { %v216_v27 = vadd.f32 %v215_v25, %v213_v26 }
 0x191   : > { %v219_v29 = vsub.f32 %v216_v27, %v218_v28 }
 0x193   : > { %v221_v30 = vsel %vm220_vm1, %v219_v29, 0.0 }
 0x194   : > { %222 = vadd.xlane.f32.xlu1 %v221_v30 }
 0x221   : > { %v223_v31 = vpop.xlane.xlu1 %222 }
 0x222   : > { %v224_v32 = vrot.slane %v223_v31, 4 }
 0x224   : > { %v225_v33 = vadd.f32 %v224_v32, %v223_v31 }
 0x226   : > { %v226_v34 = vrot.slane %v225_v33, 2 }
 0x228   : > { %v227_v35 = vadd.f32 %v226_v34, %v225_v33 }
 0x22a   : > { %v228_v36 = vrot.slane %v227_v35, 1 }
 0x22c   : > { %v229_v37 = vadd.f32 %v228_v36, %v227_v35 }
 0x22e   : > { %345 = vpush %v229_v37 }
 0x25a   : > { %235 = sbr.rel (%p339_p7) target bundleno = 609 (0x261), region = 40 }
 0x25f   : > { %s346_s18 = spop %345 }
 0x260   : > { %v231_v38 = vstv %s346_s18 }
 0x261 PF: > { %v238_v40 = vld [vmem:[#allocation7] sm:$0x1]  ;;  %vm240_vm3 = vcmask 0   ;;  %p340_p8 = scmp.ne.s32.totalorder %s577_s13, 1 }
 0x262   : > { %v239_v41 = vadd.f32 %v238_v40, %v231_v38 }
 0x263   : > { %245 = sbr.rel (%p340_p8) target bundleno = 623 (0x26f), region = 44 }
 0x264   : > { %241 = vst.msk [vmem:[#allocation7] sm:$0x1] %vm240_vm3, %v239_v41 }
 0x26b   : > { %v246_v42 = vld [vmem:[#allocation7] sm:$0x1] }
 0x26c   : > { %v247_v43 = vmul.f32 1.3333334, %v246_v42 }
 0x26e   : > { %248 = vst.msk [vmem:[#allocation7] sm:$0x1] %vm240_vm3, %v247_v43 }
 0x26f PF: > { %p363_p5 = scmp.eq.s32.totalorder %s577_s13, 1  ;;  %s542_s27 = smov [#allocation7]  }
 0x270   : > { %s256_s16 = sshll.u32 %s542_s27, 4  ;;  %s257_s16 = int_to_ptr.vmem [resolvable:$true] %s256_s16 }
 0x271   : > { %s469_s25 = scalar_lea.vmem %s257_s16, 16  ;;  %s475_s29 = scalar_lea.vmem %s257_s16, 32 }
 0x272   : > { %p470_p1 = scmp.ne.s32.totalorder %s257_s16, %s469_s25  ;;  %p476_p0 = scmp.lt.s32.totalorder %s257_s16, %s257_s16 }
 0x273   : > { %p477_p4 = scmp.lt.s32.totalorder %s475_s29, %s469_s25 }
 0x274   : > { %p471_p2 = pnand %p470_p1, %p363_p5 }
 0x275   : > { %p478_p9 = por %p477_p4, %p476_p0 }
 0x276   : > { %p472_p3 = pneg %p471_p2 }
 0x278   : > { %p479_p10 = pnand %p478_p9, %p472_p3 }
 0x27a   : > { %482 = shalt.err (!%p479_p10)
}
 0x27b   : > { %s483_s26 = scalar_lea.hbm %s739_s2, 16 }
 0x27c   : > { %p484_p11 = scmp.ne.s32.totalorder %s739_s2, %s483_s26  ;;  %p489_p12 = scmp.lt.u32.totalorder %s483_s26, %s739_s2 }
 0x27e   : > { %p485_p13 = pnand %p484_p11, %p363_p5 }
 0x280   : > { %p486_p6 = pneg %p485_p13 }
 0x282   : > { %p491_p7 = pnand %p489_p12, %p486_p6 }
 0x284   : > { %494 = shalt.err (!%p491_p7)
}
 0x285   : > { %352 = dma.vmem_to_hbm [thread:$0]  (%p363_p5), %s257_s16, 16, %s739_s2, [#allocation4]  }
 0x286   : > { %520 = dma.done.wait (%p363_p5), [#allocation4], 16  }
 0x287   : > { %522 = vsyncadd (%p363_p5), [#allocation4], 4294967280 }
 0x288 PF: > { %p16_p8 = scmp.ge.s32.totalorder %s580_s14, 4   ;;  %s748_s9 = smov %s529_s10 }
 0x289   : > { %s749_s10 = smov %s533_s11  ;;  %s750_s11 = smov %s590_s17 }
 0x28a   : > { %s751_s12 = smov %s580_s14  ;;  %18 = sbr.rel (!%p16_p8) target bundleno = 6 (0x6), region = 86 }
 0x291   :  { %269 = vsyncpa [#allocation3], 1 }
 0x292   :  { %271 = vsyncpa [#allocation3 + $0x1], 1 }
 0x293   :  { %272 = vsyncpa [#allocation6], 1 }
 0x294   :  { %274 = vsyncpa [#allocation6 + $0x1], 1 }
 0x295   :  { %275 = vsyncpa [#allocation4], 1 }
 0x296   :  { %277 = vsyncpa [#allocation4 + $0x1], 1 }

</bundles_post_ra>
